<compile_context>
chip_gen: v7x
topology: tpu7x:2x2x1
jax: 0.10.0
libtpu: 0.0.40
codegen_flags: <defaults>
</compile_context>

<pallas_src>
import functools
import math

import jax
import jax.numpy as jnp
from jax import lax
from jax.experimental import pallas as pl
from jax.experimental.pallas import tpu as pltpu


_EPS = 1e-8          # torch cosine_similarity per-norm clamp
_EPS2 = _EPS * _EPS  # clamp applied to squared norms (sqrt is monotone)


def _cosine_mean_kernel(a_ref, b_ref, o_ref, acc_ref, *, scale, n_rows, seg,
                        blocks_per_core, need_mask):
    """One grid step over a (tm, Hk) tile of (packed) rows.

    Grid is (num_cores, blocks_per_core); axis 0 is "parallel" (megacore),
    axis 1 is the "arbitrary" reduction axis.

    a_ref, b_ref : (tm, Hk) VMEM tiles in storage dtype; each tile row packs
                   `seg` original rows of h = Hk // seg features on the lanes.
    o_ref        : (1, 8, 128) per-core output block (value broadcast).
    acc_ref      : (1, 1) f32 per-core VMEM accumulator.
    scale        : static float = alpha / (R_total * (1 + temperature)).
    n_rows       : static int   = number of valid packed rows in the array.
    """
    c = pl.program_id(0)
    i = pl.program_id(1)
    tm = a_ref.shape[0]
    h = a_ref.shape[1] // seg

    @pl.when(i == 0)
    def _():
        acc_ref[...] = jnp.zeros_like(acc_ref)

    cos_col = jnp.zeros((tm, 1), jnp.float32)
    for p in range(seg):  # static unroll, seg <= 16
        sl = slice(p * h, (p + 1) * h)
        # Cast per slice: never materialize a full (tm, Hk) f32 tile.
        ap = a_ref[:, sl].astype(jnp.float32)
        bp = b_ref[:, sl].astype(jnp.float32)
        dot = jnp.sum(ap * bp, axis=-1, keepdims=True)   # (tm, 1)
        na2 = jnp.sum(ap * ap, axis=-1, keepdims=True)   # (tm, 1)
        nb2 = jnp.sum(bp * bp, axis=-1, keepdims=True)   # (tm, 1)
        # cos = dot / (max(|a|, eps) * max(|b|, eps))
        #     = dot * rsqrt(max(|a|^2, eps^2) * max(|b|^2, eps^2))   (EUP)
        cos_col = cos_col + dot * lax.rsqrt(
            jnp.maximum(na2, _EPS2) * jnp.maximum(nb2, _EPS2))

    if need_mask:
        # Logical (unclamped) block index of this step; clamped duplicates and
        # the overrun tail both land on rows >= n_rows and contribute zero.
        gi = c * blocks_per_core + i
        row = gi * tm + lax.broadcasted_iota(jnp.int32, (tm, 1), 0)
        cos_col = jnp.where(row < n_rows, cos_col, 0.0)

    acc_ref[...] += jnp.sum(cos_col, axis=0, keepdims=True)

    @pl.when(i == pl.num_programs(1) - 1)
    def _():
        val = acc_ref[0, 0] * scale
        o_ref[...] = jnp.full(o_ref.shape, val, dtype=o_ref.dtype)


def simple_cosine_forward(A, B, *, cons_alpha, temperature=0.78, tm=None):
    """JAX/Pallas equivalent of simple_cosine.forward(A, B)."""
    assert A.shape == B.shape, "A and B must have identical shapes"
    H = A.shape[-1]
    R = int(math.prod(A.shape[:-1]))  # number of cosine similarities

    a2 = A.reshape(R, H)
    b2 = B.reshape(R, H)

    # Lane packing for small hidden sizes: fold `seg` consecutive rows into
    # one lane-dense row via a free row-major reshape (no HBM copy). Pick the
    # largest power-of-two seg (<= 128 // H) that divides R.
    seg = 1
    if 0 < H < 128 and 128 % H == 0:
        seg = 128 // H            # power of two since H | 128
        while seg > 1 and R % seg != 0:
            seg //= 2
    # TODO(synk): fully arbitrary R with a segment-granularity tail mask would
    # need an HBM pad/copy, so non-divisible remainders fall back to smaller
    # (or no) packing instead.
    Rk, Hk = R // seg, H * seg
    if seg > 1:
        a2 = a2.reshape(Rk, Hk)
        b2 = b2.reshape(Rk, Hk)

    itemsize = jnp.dtype(a2.dtype).itemsize
    row_bytes = ((Hk + 127) // 128) * 128 * itemsize   # lane-padded VMEM row

    if tm is None:
        # Moderate tiles (~2 MiB / input buffer) already sit at ~85% of the
        # HBM roofline; larger tiles only hurt warm-up and VMEM pressure.
        tm = (2 * 1024 * 1024) // row_bytes
        tm = max(8, min(2048, (tm // 8) * 8))
    tm = int(min(tm, max(8, ((Rk + 7) // 8) * 8)))      # no larger than needed

    num_cores = 2  # v7x has 2 TensorCores; harmless serial split on v5e/v6e.
    total_blocks = (Rk + tm - 1) // tm
    bpc = (total_blocks + num_cores - 1) // num_cores   # blocks per core
    need_mask = (Rk % tm != 0) or (total_blocks % num_cores != 0)

    def row_map(c, i):
        blk = c * bpc + i
        if need_mask:
            blk = jnp.minimum(blk, total_blocks - 1)    # clamp; masked in kernel
        return (blk, 0)

    # Scoped VMEM from actual tile bytes (2 inputs x 2 pipeline buffers) plus
    # slack; conservative on v7x's 64 MiB and v5e's 16 MiB default.
    tile_bytes = tm * row_bytes
    vmem_limit = max(8 * 1024 * 1024,
                     min(48 * 1024 * 1024, 4 * tile_bytes + 4 * 1024 * 1024))

    scale = float(cons_alpha) / (float(R) * (1.0 + float(temperature)))

    kernel = functools.partial(
        _cosine_mean_kernel, scale=scale, n_rows=Rk, seg=seg,
        blocks_per_core=bpc, need_mask=need_mask)

    out = pl.pallas_call(
        kernel,
        out_shape=jax.ShapeDtypeStruct((num_cores, 8, 128), jnp.float32),
        grid_spec=pltpu.PrefetchScalarGridSpec(
            num_scalar_prefetch=0,
            grid=(num_cores, bpc),
            in_specs=[
                pl.BlockSpec((tm, Hk), row_map),
                pl.BlockSpec((tm, Hk), row_map),
            ],
            out_specs=pl.BlockSpec((1, 8, 128), lambda c, i: (c, 0, 0)),
            scratch_shapes=[pltpu.VMEM((1, 1), jnp.float32)],
        ),
        compiler_params=pltpu.CompilerParams(
            dimension_semantics=("parallel", "arbitrary"),
            vmem_limit_bytes=int(vmem_limit),
        ),
    )(a2, b2)

    # Per-core partials are already scaled; summing them gives alpha * mean.
    return jnp.sum(out[:, 0, 0])


def _reference(A, B, cons_alpha, temperature=0.78):
    """Mirrors torch.nn.functional.cosine_similarity semantics exactly."""
    a = A.astype(jnp.float32)
    b = B.astype(jnp.float32)
    dot = jnp.sum(a * b, axis=-1)
    na = jnp.sqrt(jnp.sum(a * a, axis=-1))
    nb = jnp.sqrt(jnp.sum(b * b, axis=-1))
    cos = dot / (jnp.maximum(na, _EPS) * jnp.maximum(nb, _EPS))
    return cons_alpha * jnp.mean(cos / (1.0 + temperature))


if __name__ == "__main__":
    # Deterministic "config" (module __init__ only uses config.cons_alpha).
    cons_alpha = 0.5
    temperature = 0.78

    key = jax.random.PRNGKey(0)
    ka, kb = jax.random.split(key)
    # (batch, seq, hidden)
    A = jax.random.normal(ka, (2, 8, 32), dtype=jnp.float32)
    B = jax.random.normal(kb, (2, 8, 32), dtype=jnp.float32)

    out = simple_cosine_forward(A, B, cons_alpha=cons_alpha,
                                temperature=temperature)
    out = jax.block_until_ready(out)

    ref = _reference(A, B, cons_alpha, temperature)
    assert jnp.allclose(out, ref, atol=1e-5, rtol=1e-5), (out, ref)

    print("KERNEL_OK")
</pallas_src>

<mosaic_0001>
module attributes {stable_mosaic.version = 11 : i64} {
  func.func @_cosine_mean_kernel(%arg0: i32, %arg1: i32, %arg2: memref<8x128xf32, #tpu.memory_space<vmem>>, %arg3: memref<8x128xf32, #tpu.memory_space<vmem>>, %arg4: memref<1x8x128xf32, #tpu.memory_space<vmem>>, %arg5: memref<1x1xf32, #tpu.memory_space<vmem>>) attributes {dimension_semantics = [#tpu.dimension_semantics<parallel>, #tpu.dimension_semantics<arbitrary>], iteration_bounds = array<i64: 2, 1>, scalar_prefetch = 0 : i64, scratch_operands = 1 : i64, tpu.core_type = #tpu.core_type<tc>, window_params = [{transform_indices = @transform_0, window_bounds = array<i64: 8, 128>}, {transform_indices = @transform_1, window_bounds = array<i64: 8, 128>}, {transform_indices = @transform_2, window_bounds = array<i64: 1, 8, 128>}]} {
    %c0_i32 = arith.constant 0 : i32
    %0 = arith.cmpi eq, %arg1, %c0_i32 : i32
    %1 = arith.extui %0 : i1 to i32
    %c0_i32_0 = arith.constant 0 : i32
    %2 = arith.cmpi ne, %1, %c0_i32_0 : i32
    scf.if %2 {
      %cst_41 = arith.constant 0.000000e+00 : f32
      %98 = vector.broadcast %cst_41 : f32 to vector<1x1xf32>
      %c0_42 = arith.constant 0 : index
      %c0_43 = arith.constant 0 : index
      %99 = vector.load %arg5[%c0_42, %c0_43] : memref<1x1xf32, #tpu.memory_space<vmem>>, vector<1x1xf32>
      tpu.vector_store %arg5[%c0_42, %c0_43], %98 {strides = array<i32>} : memref<1x1xf32, #tpu.memory_space<vmem>>, vector<1x1xf32>,
    } else {
    }
    %cst = arith.constant 0.000000e+00 : f32
    %3 = vector.broadcast %cst : f32 to vector<8x1xf32>
    %c0 = arith.constant 0 : index
    %c0_1 = arith.constant 0 : index
    %4 = vector.load %arg2[%c0, %c0_1] : memref<8x128xf32, #tpu.memory_space<vmem>>, vector<8x32xf32>
    %c0_2 = arith.constant 0 : index
    %c0_3 = arith.constant 0 : index
    %5 = vector.load %arg3[%c0_2, %c0_3] : memref<8x128xf32, #tpu.memory_space<vmem>>, vector<8x32xf32>
    %6 = arith.mulf %4, %5 : vector<8x32xf32>
    %cst_4 = arith.constant dense<0.000000e+00> : vector<8xf32>
    %7 = vector.multi_reduction <add>, %6, %cst_4 [1] : vector<8x32xf32> to vector<8xf32>
    %8 = vector.shape_cast %7 : vector<8xf32> to vector<8x1xf32>
    %9 = arith.mulf %4, %4 : vector<8x32xf32>
    %cst_5 = arith.constant dense<0.000000e+00> : vector<8xf32>
    %10 = vector.multi_reduction <add>, %9, %cst_5 [1] : vector<8x32xf32> to vector<8xf32>
    %11 = vector.shape_cast %10 : vector<8xf32> to vector<8x1xf32>
    %12 = arith.mulf %5, %5 : vector<8x32xf32>
    %cst_6 = arith.constant dense<0.000000e+00> : vector<8xf32>
    %13 = vector.multi_reduction <add>, %12, %cst_6 [1] : vector<8x32xf32> to vector<8xf32>
    %14 = vector.shape_cast %13 : vector<8xf32> to vector<8x1xf32>
    %cst_7 = arith.constant 1.000000e-16 : f32
    %15 = vector.broadcast %cst_7 : f32 to vector<8x1xf32>
    %16 = arith.maximumf %11, %15 : vector<8x1xf32>
    %cst_8 = arith.constant 1.000000e-16 : f32
    %17 = vector.broadcast %cst_8 : f32 to vector<8x1xf32>
    %18 = arith.maximumf %14, %17 : vector<8x1xf32>
    %19 = arith.mulf %16, %18 : vector<8x1xf32>
    %20 = math.rsqrt %19 : vector<8x1xf32>
    %21 = arith.mulf %8, %20 : vector<8x1xf32>
    %22 = arith.addf %3, %21 : vector<8x1xf32>
    %c0_9 = arith.constant 0 : index
    %c32 = arith.constant 32 : index
    %23 = vector.load %arg2[%c0_9, %c32] : memref<8x128xf32, #tpu.memory_space<vmem>>, vector<8x32xf32>
    %c0_10 = arith.constant 0 : index
    %c32_11 = arith.constant 32 : index
    %24 = vector.load %arg3[%c0_10, %c32_11] : memref<8x128xf32, #tpu.memory_space<vmem>>, vector<8x32xf32>
    %25 = arith.mulf %23, %24 : vector<8x32xf32>
    %cst_12 = arith.constant dense<0.000000e+00> : vector<8xf32>
    %26 = vector.multi_reduction <add>, %25, %cst_12 [1] : vector<8x32xf32> to vector<8xf32>
    %27 = vector.shape_cast %26 : vector<8xf32> to vector<8x1xf32>
    %28 = arith.mulf %23, %23 : vector<8x32xf32>
    %cst_13 = arith.constant dense<0.000000e+00> : vector<8xf32>
    %29 = vector.multi_reduction <add>, %28, %cst_13 [1] : vector<8x32xf32> to vector<8xf32>
    %30 = vector.shape_cast %29 : vector<8xf32> to vector<8x1xf32>
    %31 = arith.mulf %24, %24 : vector<8x32xf32>
    %cst_14 = arith.constant dense<0.000000e+00> : vector<8xf32>
    %32 = vector.multi_reduction <add>, %31, %cst_14 [1] : vector<8x32xf32> to vector<8xf32>
    %33 = vector.shape_cast %32 : vector<8xf32> to vector<8x1xf32>
    %cst_15 = arith.constant 1.000000e-16 : f32
    %34 = vector.broadcast %cst_15 : f32 to vector<8x1xf32>
    %35 = arith.maximumf %30, %34 : vector<8x1xf32>
    %cst_16 = arith.constant 1.000000e-16 : f32
    %36 = vector.broadcast %cst_16 : f32 to vector<8x1xf32>
    %37 = arith.maximumf %33, %36 : vector<8x1xf32>
    %38 = arith.mulf %35, %37 : vector<8x1xf32>
    %39 = math.rsqrt %38 : vector<8x1xf32>
    %40 = arith.mulf %27, %39 : vector<8x1xf32>
    %41 = arith.addf %22, %40 : vector<8x1xf32>
    %c0_17 = arith.constant 0 : index
    %c64 = arith.constant 64 : index
    %42 = vector.load %arg2[%c0_17, %c64] : memref<8x128xf32, #tpu.memory_space<vmem>>, vector<8x32xf32>
    %c0_18 = arith.constant 0 : index
    %c64_19 = arith.constant 64 : index
    %43 = vector.load %arg3[%c0_18, %c64_19] : memref<8x128xf32, #tpu.memory_space<vmem>>, vector<8x32xf32>
    %44 = arith.mulf %42, %43 : vector<8x32xf32>
    %cst_20 = arith.constant dense<0.000000e+00> : vector<8xf32>
    %45 = vector.multi_reduction <add>, %44, %cst_20 [1] : vector<8x32xf32> to vector<8xf32>
    %46 = vector.shape_cast %45 : vector<8xf32> to vector<8x1xf32>
    %47 = arith.mulf %42, %42 : vector<8x32xf32>
    %cst_21 = arith.constant dense<0.000000e+00> : vector<8xf32>
    %48 = vector.multi_reduction <add>, %47, %cst_21 [1] : vector<8x32xf32> to vector<8xf32>
    %49 = vector.shape_cast %48 : vector<8xf32> to vector<8x1xf32>
    %50 = arith.mulf %43, %43 : vector<8x32xf32>
    %cst_22 = arith.constant dense<0.000000e+00> : vector<8xf32>
    %51 = vector.multi_reduction <add>, %50, %cst_22 [1] : vector<8x32xf32> to vector<8xf32>
    %52 = vector.shape_cast %51 : vector<8xf32> to vector<8x1xf32>
    %cst_23 = arith.constant 1.000000e-16 : f32
    %53 = vector.broadcast %cst_23 : f32 to vector<8x1xf32>
    %54 = arith.maximumf %49, %53 : vector<8x1xf32>
    %cst_24 = arith.constant 1.000000e-16 : f32
    %55 = vector.broadcast %cst_24 : f32 to vector<8x1xf32>
    %56 = arith.maximumf %52, %55 : vector<8x1xf32>
    %57 = arith.mulf %54, %56 : vector<8x1xf32>
    %58 = math.rsqrt %57 : vector<8x1xf32>
    %59 = arith.mulf %46, %58 : vector<8x1xf32>
    %60 = arith.addf %41, %59 : vector<8x1xf32>
    %c0_25 = arith.constant 0 : index
    %c96 = arith.constant 96 : index
    %61 = vector.load %arg2[%c0_25, %c96] : memref<8x128xf32, #tpu.memory_space<vmem>>, vector<8x32xf32>
    %c0_26 = arith.constant 0 : index
    %c96_27 = arith.constant 96 : index
    %62 = vector.load %arg3[%c0_26, %c96_27] : memref<8x128xf32, #tpu.memory_space<vmem>>, vector<8x32xf32>
    %63 = arith.mulf %61, %62 : vector<8x32xf32>
    %cst_28 = arith.constant dense<0.000000e+00> : vector<8xf32>
    %64 = vector.multi_reduction <add>, %63, %cst_28 [1] : vector<8x32xf32> to vector<8xf32>
    %65 = vector.shape_cast %64 : vector<8xf32> to vector<8x1xf32>
    %66 = arith.mulf %61, %61 : vector<8x32xf32>
    %cst_29 = arith.constant dense<0.000000e+00> : vector<8xf32>
    %67 = vector.multi_reduction <add>, %66, %cst_29 [1] : vector<8x32xf32> to vector<8xf32>
    %68 = vector.shape_cast %67 : vector<8xf32> to vector<8x1xf32>
    %69 = arith.mulf %62, %62 : vector<8x32xf32>
    %cst_30 = arith.constant dense<0.000000e+00> : vector<8xf32>
    %70 = vector.multi_reduction <add>, %69, %cst_30 [1] : vector<8x32xf32> to vector<8xf32>
    %71 = vector.shape_cast %70 : vector<8xf32> to vector<8x1xf32>
    %cst_31 = arith.constant 1.000000e-16 : f32
    %72 = vector.broadcast %cst_31 : f32 to vector<8x1xf32>
    %73 = arith.maximumf %68, %72 : vector<8x1xf32>
    %cst_32 = arith.constant 1.000000e-16 : f32
    %74 = vector.broadcast %cst_32 : f32 to vector<8x1xf32>
    %75 = arith.maximumf %71, %74 : vector<8x1xf32>
    %76 = arith.mulf %73, %75 : vector<8x1xf32>
    %77 = math.rsqrt %76 : vector<8x1xf32>
    %78 = arith.mulf %65, %77 : vector<8x1xf32>
    %79 = arith.addf %60, %78 : vector<8x1xf32>
    %c1_i32 = arith.constant 1 : i32
    %80 = arith.muli %arg0, %c1_i32 : i32
    %81 = arith.addi %80, %arg1 : i32
    %c8_i32 = arith.constant 8 : i32
    %82 = arith.muli %81, %c8_i32 : i32
    %83 = tpu.iota {dimensions = array<i32: 0>} : vector<8x1xi32>
    %84 = vector.broadcast %82 : i32 to vector<8x1xi32>
    %85 = arith.addi %84, %83 : vector<8x1xi32>
    %c4_i32 = arith.constant 4 : i32
    %86 = vector.broadcast %c4_i32 : i32 to vector<8x1xi32>
    %87 = arith.cmpi slt, %85, %86 : vector<8x1xi32>
    %cst_33 = arith.constant 0.000000e+00 : f32
    %88 = vector.broadcast %cst_33 : f32 to vector<8x1xf32>
    %89 = arith.select %87, %79, %88 : vector<8x1xi1>, vector<8x1xf32>
    %c0_34 = arith.constant 0 : index
    %c0_35 = arith.constant 0 : index
    %90 = vector.load %arg5[%c0_34, %c0_35] : memref<1x1xf32, #tpu.memory_space<vmem>>, vector<1x1xf32>
    %cst_36 = arith.constant dense<0.000000e+00> : vector<1xf32>
    %91 = vector.multi_reduction <add>, %89, %cst_36 [0] : vector<8x1xf32> to vector<1xf32>
    %92 = vector.shape_cast %91 : vector<1xf32> to vector<1x1xf32>
    %93 = arith.addf %90, %92 : vector<1x1xf32>
    %c0_37 = arith.constant 0 : index
    %c0_38 = arith.constant 0 : index
    %94 = vector.load %arg5[%c0_37, %c0_38] : memref<1x1xf32, #tpu.memory_space<vmem>>, vector<1x1xf32>
    tpu.vector_store %arg5[%c0_37, %c0_38], %93 {strides = array<i32>} : memref<1x1xf32, #tpu.memory_space<vmem>>, vector<1x1xf32>,
    %c0_i32_39 = arith.constant 0 : i32
    %95 = arith.cmpi eq, %arg1, %c0_i32_39 : i32
    %96 = arith.extui %95 : i1 to i32
    %c0_i32_40 = arith.constant 0 : i32
    %97 = arith.cmpi ne, %96, %c0_i32_40 : i32
    scf.if %97 {
      %c0_41 = arith.constant 0 : index
      %c0_42 = arith.constant 0 : index
      %98 = vector.load %arg5[%c0_41, %c0_42] : memref<1x1xf32, #tpu.memory_space<vmem>>, vector<1x1xf32>
      %99 = vector.extract %98[0, 0] : f32 from vector<1x1xf32>
      %cst_43 = arith.constant 0.0175561793 : f32
      %100 = arith.mulf %99, %cst_43 : f32
      %101 = vector.broadcast %100 : f32 to vector<1x8x128xf32>
      %c0_44 = arith.constant 0 : index
      %c0_45 = arith.constant 0 : index
      %c0_46 = arith.constant 0 : index
      %102 = vector.load %arg4[%c0_44, %c0_45, %c0_46] : memref<1x8x128xf32, #tpu.memory_space<vmem>>, vector<1x8x128xf32>
      tpu.vector_store %arg4[%c0_44, %c0_45, %c0_46], %101 {strides = array<i32>} : memref<1x8x128xf32, #tpu.memory_space<vmem>>, vector<1x8x128xf32>,
    } else {
    }
    return
  }
  func.func @transform_0(%arg0: i32, %arg1: i32) -> (i32, i32) {
    %c1_i32 = arith.constant 1 : i32
    %0 = arith.muli %arg0, %c1_i32 : i32
    %1 = arith.addi %0, %arg1 : i32
    %c0_i32 = arith.constant 0 : i32
    %2 = arith.minsi %1, %c0_i32 : i32
    %c0_i32_0 = arith.constant 0 : i32
    %c0_i32_1 = arith.constant 0 : i32
    return %2, %c0_i32_0 : i32, i32
  }
  func.func @transform_1(%arg0: i32, %arg1: i32) -> (i32, i32) {
    %c1_i32 = arith.constant 1 : i32
    %0 = arith.muli %arg0, %c1_i32 : i32
    %1 = arith.addi %0, %arg1 : i32
    %c0_i32 = arith.constant 0 : i32
    %2 = arith.minsi %1, %c0_i32 : i32
    %c0_i32_0 = arith.constant 0 : i32
    %c0_i32_1 = arith.constant 0 : i32
    return %2, %c0_i32_0 : i32, i32
  }
  func.func @transform_2(%arg0: i32, %arg1: i32) -> (i32, i32, i32) {
    %c0_i32 = arith.constant 0 : i32
    %c0_i32_0 = arith.constant 0 : i32
    %c0_i32_1 = arith.constant 0 : i32
    return %arg0, %c0_i32, %c0_i32_0 : i32, i32, i32
  }
}

</mosaic_0001>

<bundles_post_ra>
// kernel: tpu_custom_call.1
= control target key start
LH: loop header
LB: loop body
LE: loop exit
PB: predicated region body
PF: predicated region fallthrough
CT: control target
= control target key end

     0   :  { %7 = vsyncpa [#allocation4], 0  ;;  %s1005_s0 = inlined_call_operand.hbm [shape: f32[4,128], index: 0, kind: input, shape index: {}]   ;;  %s1006_s1 = inlined_call_operand.hbm [shape: f32[4,128], index: 1, kind: input, shape index: {}]   ;;  %s1007_s2 = inlined_call_operand.hbm [shape: f32[2,8,128], index: 2, kind: output, shape index: {}]  }
   0x1   :  { %9 = vsyncpa [#allocation4 + $0x1], 0 }
   0x2   :  { %10 = vsyncpa [#allocation7], 0 }
   0x3   :  { %12 = vsyncpa [#allocation7 + $0x1], 0 }
   0x4   :  { %13 = vsyncpa [#allocation5], 0 }
   0x5   :  { %15 = vsyncpa [#allocation5 + $0x1], 0  ;;  %s818_s9 = smov 0   ;;  %s820_s10 = smov 0  }
   0x6   :  { %s822_s11 = smov 0   ;;  %s824_s12 = smov 0  }
   0x7   :  { %s826_s13 = smov 0   ;;  %s828_s14 = smov 0  }
   0x8   :  { %s830_s15 = smov 0   ;;  %s832_s16 = smov 0  }
   0x9 LB: > { %s495_s17 = sadd.s32 4294967295, %s790_s16   ;;  %s496_s18 = sadd.s32 4294967294, %s790_s16   ;;  %s790_s16 = sphi %s832_s16, %s21_s16   ;;  %s786_s15 = sphi %s830_s15, %s1019_s15   ;;  %s782_s14 = sphi %s828_s14, %s1018_s14   ;;  %s778_s13 = sphi %s826_s13, %s995_s13   ;;  %s774_s12 = sphi %s824_s12, %s1017_s12   ;;  %s770_s11 = sphi %s822_s11, %s1016_s11   ;;  %s766_s10 = sphi %s820_s10, %s1015_s10   ;;  %s762_s9 = sphi %s818_s9, %s1014_s9  }
   0xa   : > { %s33_s19 = sadd.s32 1, %s786_s15  ;;  %p759_p1 = scmp.ne.s32.totalorder %s778_s13, 0 }
   0xb   : > { %p35_p0 = scmp.ge.s32.totalorder %s33_s19, 2  ;;  %p54_p2 = scmp.eq.s32.totalorder %s790_s16, 0 }
   0xc   : > { %p59_p3 = scmp.ne.s32.totalorder %s778_s13, %s774_s12  ;;  %p60_p5 = scmp.eq.s32.totalorder %s495_s17, 0 }
   0xd   : > { %s1021_s19 = smov (%p35_p0, %s33_s19), 0  ;;  %p864_p4 = por %p759_p1, %p54_p2 }
   0xe   : > { %p868_p6 = por %p60_p5, %p59_p3  ;;  %s101_s22 = ssub.s32 %s786_s15, %s1021_s19 }
   0xf   : > { %p102_p7 = scmp.eq.s32.totalorder %s101_s22, 0  ;;  %s104_s23 = sadd.s32 1, %s770_s11 }
  0x10   : > { %p114_p8 = scmp.ne.s32.totalorder %s770_s11, %s766_s10  ;;  %p115_p9 = scmp.eq.s32.totalorder %s495_s17, 1 }
  0x11   : > { %s876_s24 = scalar_select %p102_p7, %s770_s11, %s104_s23  }
  0x12   : > { %p120_p10 = scmp.ne.s32.totalorder %s766_s10, %s762_s9  ;;  %p121_p11 = scmp.eq.s32.totalorder %s496_s18, 1 }
  0x13   : > { %p882_p12 = por %p115_p9, %p114_p8  ;;  %p1008_p0 = scmp.ge.s32.totalorder %s790_s16, 2 }
  0x14   : > { %p886_p13 = por %p121_p11, %p120_p10 }
  0x15   : > { %137 = sbr.rel (%p1008_p0) target bundleno = 82 (0x52), region = 16 }
  0x1c   : > { %140 = sbr.rel (!%p864_p4) target bundleno = 55 (0x37), region = 20 }
  0x23   : > { %154 = vsyncadd [#allocation4], 64  ;;  %s792_s27 = smov [#allocation3]   ;;  %s623_s3 = scalar_lea.hbm %s1005_s0, 64 }
  0x24   : > { %s159_s28 = sshll.u32 %s792_s27, 4  ;;  %p624_p1 = scmp.ne.s32.totalorder %s1005_s0, %s623_s3  ;;  %s160_s28 = int_to_ptr.vmem [resolvable:$true] %s159_s28 }
  0x25   : > { %p629_p2 = scmp.lt.u32.totalorder %s623_s3, %s623_s3  ;;  %p631_p3 = scmp.lt.u32.totalorder %s623_s3, %s1005_s0 }
  0x27   : > { %p632_p5 = por %p631_p3, %p629_p2 }
  0x29   : > { %p633_p7 = pnand %p632_p5, %p624_p1 }
  0x2b   : > { %636 = shalt.err (!%p633_p7)
}
  0x2c   : > { %s637_s8 = scalar_lea.vmem %s160_s28, 64  ;;  %s643_s12 = scalar_lea.vmem %s160_s28, 256 }
  0x2d   : > { %p638_p8 = scmp.ne.s32.totalorder %s160_s28, %s637_s8  ;;  %p644_p9 = scmp.lt.s32.totalorder %s160_s28, %s160_s28 }
  0x2e   : > { %p645_p10 = scmp.lt.s32.totalorder %s643_s12, %s637_s8 }
  0x30   : > { %p646_p11 = por %p645_p10, %p644_p9 }
  0x32   : > { %p647_p0 = pnand %p646_p11, %p638_p8 }
  0x34   : > { %650 = shalt.err (!%p647_p0)
}
  0x35   : > { %s793_s17 = smov 64   ;;  %s794_s18 = smov 4  }
  0x36   : > { %165 = dma.hbm_to_vmem [thread:$0]  %s1005_s0, 64, %s160_s28, [#allocation4], %s793_s17, %s793_s17, %s794_s18  }
  0x37 PF: > { %168 = sbr.rel (!%p864_p4) target bundleno = 82 (0x52), region = 24 }
  0x3e   : > { %182 = vsyncadd [#allocation7], 64  ;;  %s795_s27 = smov [#allocation6]   ;;  %s651_s4 = scalar_lea.hbm %s1006_s1, 64 }
  0x3f   : > { %s187_s29 = sshll.u32 %s795_s27, 4  ;;  %p652_p0 = scmp.ne.s32.totalorder %s1006_s1, %s651_s4  ;;  %s188_s29 = int_to_ptr.vmem [resolvable:$true] %s187_s29 }
  0x40   : > { %p657_p1 = scmp.lt.u32.totalorder %s651_s4, %s651_s4  ;;  %p659_p2 = scmp.lt.u32.totalorder %s651_s4, %s1006_s1 }
  0x42   : > { %p660_p3 = por %p659_p2, %p657_p1 }
  0x44   : > { %p661_p5 = pnand %p660_p3, %p652_p0 }
  0x46   : > { %664 = shalt.err (!%p661_p5)
}
  0x47   : > { %s665_s20 = scalar_lea.vmem %s188_s29, 64  ;;  %s671_s28 = scalar_lea.vmem %s188_s29, 256 }
  0x48   : > { %p666_p4 = scmp.ne.s32.totalorder %s188_s29, %s665_s20  ;;  %p672_p7 = scmp.lt.s32.totalorder %s188_s29, %s188_s29 }
  0x49   : > { %p673_p8 = scmp.lt.s32.totalorder %s671_s28, %s665_s20 }
  0x4b   : > { %p674_p9 = por %p673_p8, %p672_p7 }
  0x4d   : > { %p675_p10 = pnand %p674_p9, %p666_p4 }
  0x4f   : > { %678 = shalt.err (!%p675_p10)
}
  0x50   : > { %s796_s12 = smov 64   ;;  %s797_s17 = smov 4  }
  0x51   : > { %193 = dma.hbm_to_vmem [thread:$0]  %s1006_s1, 64, %s188_s29, [#allocation7], %s796_s12, %s796_s12, %s797_s17  }
  0x52 PF: > { %p513_p11 = scmp.ge.s32.totalorder %s790_s16, 1  ;;  %p195_p0 = scmp.lt.s32.totalorder %s790_s16, 3 }
  0x54   : > { %p196_p1 = pnand %p513_p11, %p195_p0 }
  0x55   : > { %s201_s23 = sand.u32 (!%p196_p1), 1, %s778_s13  }
  0x56   : > { %199 = sbr.rel (%p196_p1) target bundleno = 526 (0x20e), region = 28  ;;  %s514_s27 = sshll.u32 (!%p196_p1), %s201_s23, 3 }
  0x57   : > { %s202_s30 = scalar_lea.sflag (!%p196_p1), [#allocation4], %s201_s23  ;;  %s205_s3 = scalar_lea.vmem (!%p196_p1), [#allocation3], %s514_s27 }
  0x5d   : > { %744 = dma.done.wait (%p868_p6), %s202_s30, 128  }
  0x5e   : > { %746 = vsyncadd (%p868_p6), %s202_s30, 4294967168  ;;  %s211_s29 = scalar_lea.sflag [#allocation7], %s201_s23  ;;  %s214_s4 = scalar_lea.vmem [#allocation6], %s514_s27 }
  0x5f   : > { %748 = dma.done.wait (%p868_p6), %s211_s29, 128  }
  0x60   : > { %750 = vsyncadd (%p868_p6), %s211_s29, 4294967168  ;;  %vm256_vm0 = vcmask 0   ;;  %v798_v0 = vmov 0.0   ;;  %v259_v1 = vld [vmem:[%s214_s4] sm:$0xff]  ;;  %vm261_vm1 = vcmask 261120   ;;  %v258_v2 = vld [vmem:[%s205_s3] sm:$0xff]  ;;  %v356_v52 = vlaneseq }
  0x61   : > { %257 = vst.msk [vmem:[#allocation2] sm:$0x1] %vm256_vm0, %v798_v0  ;;  %v269_v3 = vmul.f32 %v259_v1, %v259_v1  ;;  %v260_v4 = vmul.f32 %v259_v1, %v258_v2  ;;  %v265_v5 = vmul.f32 %v258_v2, %v258_v2  ;;  %s799_s21 = smov 96   ;;  %s800_s5 = smov 64  }
  0x62   : > { %s801_s6 = smov 32   ;;  %s517_s7 = sshll.u32 %s782_s14, 3  ;;  %v357_v54 = vshrl.u32 %v356_v52, 7 }
  0x63   : > { %v270_v6 = vsel %vm261_vm1, %v269_v3, 0.0  ;;  %v262_v7 = vsel %vm261_vm1, %v260_v4, 0.0  ;;  %v266_v8 = vsel %vm261_vm1, %v265_v5, 0.0  ;;  %v358_v56 = vstv %s517_s7  ;;  %s237_s8 = sand.u32 1, %s766_s10   ;;  %s519_s17 = sshll.u32 %s782_s14, 7 }
  0x64   : > { %271 = vadd.xlane.f32.xlu1 %v270_v6  ;;  %263 = vadd.xlane.f32.xlu0 %v262_v7  ;;  %v359_v59 = vadd.s32 %v358_v56, %v357_v54  ;;  %s516_s20 = sshll.u32 %s237_s8, 3  ;;  %s952_s30 = scalar_lea.hbm %s1007_s2, %s519_s17 }
  0x65   : > { %s239_s28 = scalar_lea.vmem [#allocation8], %s516_s20  ;;  %s381_s3 = scalar_lea.sflag [#allocation5], %s237_s8 }
  0x66   : > { %vm360_vm2 = vcmp.lt.s32.totalorder %v359_v59, 4  ;;  %s394_s12 = sshll.u32 %s239_s28, 4  ;;  %s802_s14 = smov [#allocation8]   ;;  %s954_s12 = int_to_ptr.vmem [resolvable:$true] %s394_s12 }
  0x67   : > { %s679_s29 = scalar_lea.vmem %s954_s12, 128  ;;  %s683_s4 = sshll.u32 %s802_s14, 4  ;;  %s684_s4 = int_to_ptr.vmem [resolvable:$false] %s683_s4 }
  0x68   : > { %267 = vadd.xlane.f32.xlu0 %v266_v8  ;;  %v362_v8 = vld [vmem:[#allocation2] sm:$0x1]  ;;  %p680_p6 = scmp.ne.s32.totalorder %s954_s12, %s679_s29  ;;  %p686_p5 = scmp.lt.s32.totalorder %s954_s12, %s684_s4 }
  0x6a   : > { %p681_p2 = pnand %p680_p6, %p882_p12 }
  0x6c   : > { %p682_p3 = pneg %p681_p2 }
  0x75   : > { %280 = vrot.lane.b32.xlu1 %v260_v4, %s799_s21 }
  0x79   : > { %294 = vrot.lane.b32.xlu1 %v269_v3, %s799_s21 }
  0x7d   : > { %312 = vrot.lane.b32.xlu1 %v265_v5, %s800_s5 }
  0x7e   : > { %287 = vrot.lane.b32.xlu0 %v265_v5, %s799_s21  ;;  %s685_s21 = scalar_lea.vmem %s684_s4, 256 }
  0x7f   : > { %p687_p4 = scmp.lt.s32.totalorder %s685_s21, %s679_s29 }
  0x81   : > { %318 = vrot.lane.b32.xlu1 %v269_v3, %s800_s5  ;;  %p688_p7 = por %p687_p4, %p686_p5 }
  0x82   : > { %342 = vrot.lane.b32.xlu0 %v269_v3, %s801_s6 }
  0x83   : > { %p689_p8 = pnand %p688_p7, %p682_p3 }
  0x85   : > { %336 = vrot.lane.b32.xlu1 %v265_v5, %s801_s6 }
  0x86   : > { %330 = vrot.lane.b32.xlu0 %v260_v4, %s801_s6 }
  0x89   : > { %306 = vrot.lane.b32.xlu1 %v260_v4, %s800_s5 }
  0xf1   : > { %v272_v9 = vpop.xlane.xlu1 %271  ;;  %v264_v10 = vpop.xlane.xlu0 %263 }
  0xf2   : > { %v274_v13 = vmax.f32 %v272_v9, 1e-16 }
  0xf5   : > { %v281_v11 = vpop.permute.xlu1 %280  ;;  %v268_v12 = vpop.xlane.xlu0 %267 }
  0xf6   : > { %v273_v14 = vmax.f32 %v268_v12, 1e-16  ;;  %v283_v15 = vsel %vm261_vm1, %v281_v11, 0.0 }
  0xf7   : > { %284 = vadd.xlane.f32.xlu0 %v283_v15 }
  0xf8   : > { %v275_v16 = vmul.f32 %v274_v13, %v273_v14 }
  0xf9   : > { %v295_v17 = vpop.permute.xlu1 %294  ;;  %v288_v18 = vpop.permute.xlu0 %287 }
  0xfa   : > { %615 = vrsqrt.f32 %v275_v16  ;;  %v297_v19 = vsel %vm261_vm1, %v295_v17, 0.0  ;;  %v290_v20 = vsel %vm261_vm1, %v288_v18, 0.0 }
  0xfb   : > { %298 = vadd.xlane.f32.xlu0 %v297_v19  ;;  %291 = vadd.xlane.f32.xlu1 %v290_v20 }
  0xfd   : > { %v313_v21 = vpop.permute.xlu1 %312  ;;  %v343_v23 = vpop.permute.xlu0 %342 }
  0xfe   : > { %v345_v26 = vsel %vm261_vm1, %v343_v23, 0.0  ;;  %v315_v31 = vsel %vm261_vm1, %v313_v21, 0.0 }
 0x101   : > { %v319_v22 = vpop.permute.xlu1 %318  ;;  %v331_v32 = vpop.permute.xlu0 %330 }
 0x102   : > { %v321_v24 = vsel %vm261_vm1, %v319_v22, 0.0  ;;  %v333_v34 = vsel %vm261_vm1, %v331_v32, 0.0 }
 0x103   : > { %322 = vadd.xlane.f32.xlu1 %v321_v24 }
 0x104   : > { %v616_v25 = vpop.eup %615 }
 0x105   : > { %v337_v27 = vpop.permute.xlu1 %336  ;;  %v277_v28 = vmul.f32 %v616_v25, %v264_v10 }
 0x106   : > { %v339_v33 = vsel %vm261_vm1, %v337_v27, 0.0 }
 0x107   : > { %346 = vadd.xlane.f32.xlu1 %v345_v26 }
 0x109   : > { %v307_v29 = vpop.permute.xlu1 %306 }
 0x10a   : > { %v309_v30 = vsel %vm261_vm1, %v307_v29, 0.0 }
 0x10b   : > { %310 = vadd.xlane.f32.xlu0 %v309_v30 }
 0x10f   : > { %316 = vadd.xlane.f32.xlu0 %v315_v31 }
 0x113   : > { %340 = vadd.xlane.f32.xlu0 %v339_v33 }
 0x117   : > { %334 = vadd.xlane.f32.xlu0 %v333_v34 }
 0x184   : > { %v285_v35 = vpop.xlane.xlu0 %284 }
 0x188   : > { %v292_v36 = vpop.xlane.xlu1 %291  ;;  %v299_v37 = vpop.xlane.xlu0 %298 }
 0x189   : > { %v300_v38 = vmax.f32 %v292_v36, 1e-16  ;;  %v301_v39 = vmax.f32 %v299_v37, 1e-16 }
 0x18b   : > { %v302_v42 = vmul.f32 %v301_v39, %v300_v38 }
 0x18d   : > { %617 = vrsqrt.f32 %v302_v42 }
 0x190   : > { %v323_v40 = vpop.xlane.xlu1 %322 }
 0x191   : > { %v325_v45 = vmax.f32 %v323_v40, 1e-16 }
 0x194   : > { %v347_v44 = vpop.xlane.xlu1 %346 }
 0x195   : > { %v349_v48 = vmax.f32 %v347_v44, 1e-16 }
 0x197   : > { %v618_v53 = vpop.eup %617 }
 0x198   : > { %v311_v41 = vpop.xlane.xlu0 %310  ;;  %v304_v55 = vmul.f32 %v618_v53, %v285_v35 }
 0x19a   : > { %v305_v61 = vadd.f32 %v304_v55, %v277_v28 }
 0x19c   : > { %v317_v43 = vpop.xlane.xlu0 %316 }
 0x19d   : > { %v324_v46 = vmax.f32 %v317_v43, 1e-16 }
 0x19f   : > { %v326_v47 = vmul.f32 %v325_v45, %v324_v46 }
 0x1a0   : > { %v341_v49 = vpop.xlane.xlu0 %340 }
 0x1a1   : > { %619 = vrsqrt.f32 %v326_v47  ;;  %v348_v50 = vmax.f32 %v341_v49, 1e-16 }
 0x1a3   : > { %v350_v51 = vmul.f32 %v349_v48, %v348_v50 }
 0x1a4   : > { %v335_v60 = vpop.xlane.xlu0 %334 }
 0x1a5   : > { %621 = vrsqrt.f32 %v350_v51 }
 0x1ab   : > { %v620_v57 = vpop.eup %619 }
 0x1ac   : > { %v328_v58 = vmul.f32 %v620_v57, %v311_v41 }
 0x1ae   : > { %v329_v63 = vadd.f32 %v328_v58, %v305_v61 }
 0x1af   : > { %v622_v62 = vpop.eup %621 }
 0x1b0   : > { %v352_v0 = vmul.f32 %v622_v62, %v335_v60 }
 0x1b2   : > { %v353_v1 = vadd.f32 %v352_v0, %v329_v63 }
 0x1b4   : > { %v361_v2 = vsel %vm360_vm2, %v353_v1, 0.0 }
 0x1b5   : > { %v363_v3 = vrot.slane %v361_v2, 4 }
 0x1b7   : > { %v364_v4 = vadd.f32 %v363_v3, %v361_v2 }
 0x1b9   : > { %v365_v5 = vrot.slane %v364_v4, 2 }
 0x1bb   : > { %v366_v6 = vadd.f32 %v365_v5, %v364_v4 }
 0x1bd   : > { %v367_v7 = vrot.slane %v366_v6, 1 }
 0x1bf   : > { %v368_v9 = vadd.f32 %v367_v7, %v366_v6 }
 0x1c1   : > { %v369_v10 = vadd.f32 %v368_v9, %v362_v8 }
 0x1c3   : > { %371 = vst.msk [vmem:[#allocation2] sm:$0x1] %vm256_vm0, %v369_v10 }
 0x1ca   : > { %v375_v11 = vld [vmem:[#allocation2] sm:$0x1] }
 0x1cb   : > { %524 = vpush %v375_v11 }
 0x1fc   : > { %s525_s18 = spop %524 }
 0x1fd   : > { %s377_s22 = smul.f32 0.01755618, %s525_s18 }
 0x1ff   : > { %v378_v12 = vstv %s377_s22 }
 0x200   : > { %379 = vst [vmem:[%s239_s28] sm:$0xff] %v378_v12 }
 0x201   : > { %692 = shalt.err (!%p689_p8)
}
 0x202   : > { %s693_s5 = scalar_lea.hbm %s952_s30, 128  ;;  %s697_s8 = scalar_lea.hbm %s1007_s2, 256 }
 0x203   : > { %p694_p9 = scmp.ne.s32.totalorder %s952_s30, %s693_s5  ;;  %p698_p0 = scmp.lt.u32.totalorder %s952_s30, %s1007_s2 }
 0x204   : > { %p699_p1 = scmp.lt.u32.totalorder %s697_s8, %s693_s5  ;;  %p701_p2 = scmp.lt.u32.totalorder %s693_s5, %s952_s30 }
 0x205   : > { %p695_p10 = pnand %p694_p9, %p882_p12 }
 0x206   : > { %p700_p6 = por %p699_p1, %p698_p0 }
 0x207   : > { %p696_p11 = pneg %p695_p10 }
 0x208   : > { %p702_p3 = por %p701_p2, %p700_p6 }
 0x20a   : > { %p703_p5 = pnand %p702_p3, %p696_p11 }
 0x20c   : > { %706 = shalt.err (!%p703_p5)
}
 0x20d   : > { %528 = dma.vmem_to_hbm [thread:$0]  (%p882_p12), %s954_s12, 128, %s952_s30, %s381_s3  }
 0x20e PF: > { %s406_s17 = sand.u32 1, %s762_s9   ;;  %p1013_p4 = scmp.ge.s32.totalorder %s790_s16, 2 }
 0x20f   : > { %s407_s18 = scalar_lea.sflag [#allocation5], %s406_s17 }
 0x210   : > { %p531_p7 = pnand %p1013_p4, %p886_p13 }
 0x212   : > { %752 = dma.done.wait (!%p531_p7), %s407_s18, 128  }
 0x213   : > { %754 = vsyncadd (!%p531_p7), %s407_s18, 4294967168  ;;  %s21_s16 = sadd.s32 1, %s790_s16   ;;  %s1014_s9 = smov %s766_s10 }
 0x214   : > { %p18_p8 = scmp.ge.s32.totalorder %s21_s16, 4   ;;  %s1015_s10 = smov %s770_s11 }
 0x215   : > { %s1016_s11 = smov %s876_s24  ;;  %s1017_s12 = smov %s778_s13 }
 0x216   : > { %s995_s13 = smov 0   ;;  %s1018_s14 = smov %s786_s15 }
 0x217   : > { %s1019_s15 = smov %s1021_s19  ;;  %20 = sbr.rel (!%p18_p8) target bundleno = 9 (0x9), region = 94 }
 0x21e   :  { %412 = vsyncpa [#allocation4], 1 }
 0x21f   :  { %414 = vsyncpa [#allocation4 + $0x1], 1 }
 0x220   :  { %415 = vsyncpa [#allocation7], 1 }
 0x221   :  { %417 = vsyncpa [#allocation7 + $0x1], 1 }
 0x222   :  { %418 = vsyncpa [#allocation5], 1 }
 0x223   :  { %420 = vsyncpa [#allocation5 + $0x1], 1 }

</bundles_post_ra>
